<compile_context>
chip_gen: v7x
topology: tpu7x:2x2x1
jax: 0.10.0
libtpu: 0.0.40
codegen_flags: <defaults>
</compile_context>

<pallas_src>
import jax
import jax.numpy as jnp
from jax.experimental import pallas as pl
from jax.experimental.pallas import tpu as pltpu

NEG_SLOPE = 0.01   # F.leaky_relu_ default
BN_EPS = 1e-5      # nn.BatchNorm2d default


def _leaky(x):
    return jnp.where(x >= 0, x, NEG_SLOPE * x)


# ----------------------------- Pallas kernels -----------------------------

def upsample_kernel(x_ref, w_ref, o_ref):
    # One batched MXU matmul for ConvTranspose2d(k=2, s=2, bias=False):
    # (B*T2*F2, Cin) @ (Cin, 4*Cin).  bf16 inputs, f32 accumulation.
    x = x_ref[...].astype(jnp.bfloat16)
    o_ref[...] = jnp.dot(x, w_ref[...], preferred_element_type=jnp.float32)


def make_convblock_kernel(T, F_, cin, cout, is_shortcut):
    cin2 = 2 * cin
    cmax = max(cin2, cout)
    TF = T * F_
    taps = [(dh, dw) for dh in range(3) for dw in range(3)]

    def kernel(up_ref, lat_ref, s1u_ref, b1u_ref, s1l_ref, b1l_ref,
               w1_ref, s2_ref, b2_ref, w2_ref, *rest):
        if is_shortcut:
            wsu_ref, wsl_ref, bs_ref, o_ref, pad, pat = rest
        else:
            o_ref, pad, pat = rest

        # Zero only the 1-pixel halo ring; the interior is fully overwritten
        # every iteration.  (Removes the two full-image zeroing store passes
        # and stays correct if the batch grid is split across TensorCores.)
        pad[0:1, :, :] = jnp.zeros((1, F_ + 2, cmax), jnp.float32)
        pad[T + 1:T + 2, :, :] = jnp.zeros((1, F_ + 2, cmax), jnp.float32)
        pad[:, 0:1, :] = jnp.zeros((T + 2, 1, cmax), jnp.float32)
        pad[:, F_ + 1:F_ + 2, :] = jnp.zeros((T + 2, 1, cmax), jnp.float32)

        up = up_ref[0].astype(jnp.float32)     # (T, F, cin)
        lat = lat_ref[0].astype(jnp.float32)   # (T, F, cin)

        # --- BN1 (eval-mode folded affine) + LeakyReLU, per concat half ---
        # (the channel concat happens directly inside the padded scratch)
        act_up = _leaky(up * s1u_ref[0] + b1u_ref[0])
        act_lat = _leaky(lat * s1l_ref[0] + b1l_ref[0])
        pad[1:T + 1, 1:F_ + 1, 0:cin] = act_up
        pad[1:T + 1, 1:F_ + 1, cin:cin2] = act_lat

        # --- conv1: 3x3, bias=False, ONE im2col matmul (TF,9*cin2)@(9*cin2,cout)
        for k, (dh, dw) in enumerate(taps):
            pat[:, k * cin2:(k + 1) * cin2] = (
                pad[dh:dh + T, dw:dw + F_, 0:cin2].reshape(TF, cin2))
        h = jnp.dot(pat[:, 0:9 * cin2].astype(jnp.bfloat16), w1_ref[...],
                    preferred_element_type=jnp.float32)            # (TF, cout)

        # --- BN2 (eval-mode folded affine) + LeakyReLU (f32 VPU math) ---
        act2 = _leaky(h * s2_ref[0] + b2_ref[0])
        pad[1:T + 1, 1:F_ + 1, 0:cout] = act2.reshape(T, F_, cout)

        # --- conv2: 3x3, bias=False, ONE im2col matmul (TF,9*cout)@(9*cout,cout)
        for k, (dh, dw) in enumerate(taps):
            pat[:, k * cout:(k + 1) * cout] = (
                pad[dh:dh + T, dw:dw + F_, 0:cout].reshape(TF, cout))
        h2 = jnp.dot(pat[:, 0:9 * cout].astype(jnp.bfloat16), w2_ref[...],
                     preferred_element_type=jnp.float32)           # (TF, cout)

        # --- shortcut (1x1 conv + bias, split over the two halves) + residual
        if is_shortcut:
            sc = (jnp.dot(up.reshape(TF, cin).astype(jnp.bfloat16), wsu_ref[...],
                          preferred_element_type=jnp.float32)
                  + jnp.dot(lat.reshape(TF, cin).astype(jnp.bfloat16), wsl_ref[...],
                            preferred_element_type=jnp.float32)
                  + bs_ref[0])
            o_ref[0] = (sc + h2).reshape(T, F_, cout).astype(o_ref.dtype)
        else:
            # cout == cin2: residual add of the (pre-BN) concatenated input.
            o3 = h2.reshape(T, F_, cout)
            o_ref[0, :, :, 0:cin] = (o3[:, :, 0:cin] + up).astype(o_ref.dtype)
            o_ref[0, :, :, cin:cout] = (o3[:, :, cin:cout] + lat).astype(o_ref.dtype)

    return kernel


# ------------------------------- Wrapper -----------------------------------

def decoder_block_forward(x_nchw, latent_nchw, params):
    # NCHW -> NHWC (glue)
    x = jnp.transpose(x_nchw, (0, 2, 3, 1))             # (b, t/2, f/2, cin)
    latent = jnp.transpose(latent_nchw, (0, 2, 3, 1))   # (b, t, f, cin)
    b, t2, f2, cin = x.shape
    T, F_ = 2 * t2, 2 * f2
    cin2 = 2 * cin
    cout = params["w1"].shape[-1]
    is_shortcut = (cin2 != cout)
    M = b * t2 * f2

    # ---- upsample: ConvTranspose2d(cin, cin, k=2, s=2, bias=False) ----
    # torch weight layout (ic, oc, kh, kw) -> matmul matrix (ic, (kh, kw, oc))
    w_up_mat = (jnp.transpose(params["w_up"], (0, 2, 3, 1))
                .reshape(cin, 4 * cin).astype(jnp.bfloat16))
    x2d = x.reshape(M, cin)
    y = pl.pallas_call(
        upsample_kernel,
        out_shape=jax.ShapeDtypeStruct((M, 4 * cin), jnp.float32),
        grid=(1,),
        in_specs=[pl.BlockSpec((M, cin), lambda i: (0, 0)),
                  pl.BlockSpec((cin, 4 * cin), lambda i: (0, 0))],
        out_specs=pl.BlockSpec((M, 4 * cin), lambda i: (0, 0)),
    )(x2d, w_up_mat)
    # interleave the 2x2 taps into the stride-2 output grid (tiny layout glue)
    up = (y.reshape(b, t2, f2, 2, 2, cin).transpose(0, 1, 3, 2, 4, 5)
          .reshape(b, T, F_, cin))

    # fold eval-mode BN into per-channel scale/shift
    def bn_fold(gamma, beta, mean, var):
        s = gamma / jnp.sqrt(var + BN_EPS)
        return s, beta - mean * s

    s1, sh1 = bn_fold(params["bn1_gamma"], params["bn1_beta"],
                      params["bn1_mean"], params["bn1_var"])
    s2, sh2 = bn_fold(params["bn2_gamma"], params["bn2_beta"],
                      params["bn2_mean"], params["bn2_var"])

    # split BN1 (and the 1x1 shortcut weight) over the two concat halves
    # (up | latent) so the concat never materializes in HBM.
    s1u, s1l = s1[:cin].reshape(1, cin), s1[cin:].reshape(1, cin)
    b1u, b1l = sh1[:cin].reshape(1, cin), sh1[cin:].reshape(1, cin)
    s2r, b2r = s2.reshape(1, cout), sh2.reshape(1, cout)

    # im2col weight matrices: rows ordered (kh, kw, c) to match patch columns.
    w1_mat = params["w1"].reshape(9 * cin2, cout).astype(jnp.bfloat16)
    w2_mat = params["w2"].reshape(9 * cout, cout).astype(jnp.bfloat16)

    kernel = make_convblock_kernel(T, F_, cin, cout, is_shortcut)
    in_specs = [
        pl.BlockSpec((1, T, F_, cin), lambda i: (i, 0, 0, 0)),   # up
        pl.BlockSpec((1, T, F_, cin), lambda i: (i, 0, 0, 0)),   # latent
        pl.BlockSpec((1, cin), lambda i: (0, 0)),                # s1 (up half)
        pl.BlockSpec((1, cin), lambda i: (0, 0)),                # b1 (up half)
        pl.BlockSpec((1, cin), lambda i: (0, 0)),                # s1 (lat half)
        pl.BlockSpec((1, cin), lambda i: (0, 0)),                # b1 (lat half)
        pl.BlockSpec((9 * cin2, cout), lambda i: (0, 0)),        # w1 (im2col)
        pl.BlockSpec((1, cout), lambda i: (0, 0)),               # s2
        pl.BlockSpec((1, cout), lambda i: (0, 0)),               # b2
        pl.BlockSpec((9 * cout, cout), lambda i: (0, 0)),        # w2 (im2col)
    ]
    args = [up, latent, s1u, b1u, s1l, b1l, w1_mat, s2r, b2r, w2_mat]
    if is_shortcut:
        wsu = params["ws"][:cin].astype(jnp.bfloat16)
        wsl = params["ws"][cin:].astype(jnp.bfloat16)
        in_specs += [pl.BlockSpec((cin, cout), lambda i: (0, 0)),
                     pl.BlockSpec((cin, cout), lambda i: (0, 0)),
                     pl.BlockSpec((1, cout), lambda i: (0, 0))]
        args += [wsu, wsl, params["bs"].reshape(1, cout)]

    cmax = max(cin2, cout)
    out = pl.pallas_call(
        kernel,
        out_shape=jax.ShapeDtypeStruct((b, T, F_, cout), jnp.float32),
        grid=(b,),
        in_specs=in_specs,
        out_specs=pl.BlockSpec((1, T, F_, cout), lambda i: (i, 0, 0, 0)),
        scratch_shapes=[
            pltpu.VMEM((T + 2, F_ + 2, cmax), jnp.float32),   # shared padded image
            pltpu.VMEM((T * F_, 9 * cmax), jnp.float32),      # shared im2col patches
        ],
        compiler_params=pltpu.CompilerParams(
            dimension_semantics=("parallel",),
            vmem_limit_bytes=32 * 1024 * 1024),
    )(*args)

    # NHWC -> NCHW (module contract)
    return jnp.transpose(out, (0, 3, 1, 2))


# ------------------------ pure-JAX reference (check) ------------------------

def decoder_block_reference(x_nchw, latent_nchw, params):
    x = jnp.transpose(x_nchw, (0, 2, 3, 1))
    latent = jnp.transpose(latent_nchw, (0, 2, 3, 1))
    b, t2, f2, cin = x.shape
    # transposed conv k=2, s=2: out[b, 2i+kh, 2j+kw, oc] = sum_ic x * W[ic,oc,kh,kw]
    up6 = jnp.einsum("bijc,cokl->bikjlo", x, params["w_up"])
    up = up6.reshape(b, 2 * t2, 2 * f2, cin)
    xcat = jnp.concatenate([up, latent], axis=-1)

    def bn(v, g, be, m, var):
        return (v - m) / jnp.sqrt(var + BN_EPS) * g + be

    dn = ("NHWC", "HWIO", "NHWC")
    a = _leaky(bn(xcat, params["bn1_gamma"], params["bn1_beta"],
                  params["bn1_mean"], params["bn1_var"]))
    h = jax.lax.conv_general_dilated(a, params["w1"], (1, 1), "SAME",
                                     dimension_numbers=dn)
    a2 = _leaky(bn(h, params["bn2_gamma"], params["bn2_beta"],
                   params["bn2_mean"], params["bn2_var"]))
    h2 = jax.lax.conv_general_dilated(a2, params["w2"], (1, 1), "SAME",
                                      dimension_numbers=dn)
    cin2, cout = 2 * cin, params["w1"].shape[-1]
    if cin2 != cout:
        out = jnp.einsum("bijc,cd->bijd", xcat, params["ws"]) + params["bs"] + h2
    else:
        out = xcat + h2
    return jnp.transpose(out, (0, 3, 1, 2))


# --------------------------------- main -------------------------------------

if __name__ == "__main__":
    B, C_IN, C_OUT, T, F_ = 2, 4, 6, 16, 16

    key = jax.random.PRNGKey(0)
    ks = jax.random.split(key, 16)
    params = {
        # ConvTranspose2d weight: (in_channels, out_channels, kH, kW)
        "w_up": 0.2 * jax.random.normal(ks[0], (C_IN, C_IN, 2, 2), jnp.float32),
        # conv weights stored HWIO: (kh, kw, cin, cout)
        "w1": 0.2 * jax.random.normal(ks[1], (3, 3, 2 * C_IN, C_OUT), jnp.float32),
        "w2": 0.2 * jax.random.normal(ks[2], (3, 3, C_OUT, C_OUT), jnp.float32),
        # 1x1 shortcut conv (cin2 -> cout) with bias
        "ws": 0.2 * jax.random.normal(ks[3], (2 * C_IN, C_OUT), jnp.float32),
        "bs": 0.1 * jax.random.normal(ks[4], (C_OUT,), jnp.float32),
        # BatchNorm (eval-mode) params / running stats
        "bn1_gamma": 1.0 + 0.1 * jax.random.normal(ks[5], (2 * C_IN,), jnp.float32),
        "bn1_beta": 0.1 * jax.random.normal(ks[6], (2 * C_IN,), jnp.float32),
        "bn1_mean": 0.1 * jax.random.normal(ks[7], (2 * C_IN,), jnp.float32),
        "bn1_var": 1.0 + 0.1 * jax.random.uniform(ks[8], (2 * C_IN,), jnp.float32),
        "bn2_gamma": 1.0 + 0.1 * jax.random.normal(ks[9], (C_OUT,), jnp.float32),
        "bn2_beta": 0.1 * jax.random.normal(ks[10], (C_OUT,), jnp.float32),
        "bn2_mean": 0.1 * jax.random.normal(ks[11], (C_OUT,), jnp.float32),
        "bn2_var": 1.0 + 0.1 * jax.random.uniform(ks[12], (C_OUT,), jnp.float32),
    }

    # Module inputs (NCHW, matching the PyTorch forward signature)
    x_nchw = jax.random.normal(ks[13], (B, C_IN, T // 2, F_ // 2), jnp.float32)
    latent_nchw = jax.random.normal(ks[14], (B, C_IN, T, F_), jnp.float32)

    out = decoder_block_forward(x_nchw, latent_nchw, params)
    out = jax.block_until_ready(out)

    ref = decoder_block_reference(x_nchw, latent_nchw, params)
    assert out.shape == (B, C_OUT, T, F_), out.shape
    max_err = float(jnp.max(jnp.abs(out - ref)))
    assert jnp.allclose(out, ref, atol=5e-2, rtol=5e-2), f"max_err={max_err}"

    print("KERNEL_OK")
</pallas_src>

<mosaic_0001>
module attributes {stable_mosaic.version = 11 : i64} {
  func.func @upsample_kernel(%arg0: i32, %arg1: memref<128x4xf32, #tpu.memory_space<vmem>>, %arg2: memref<4x16xbf16, #tpu.memory_space<vmem>>, %arg3: memref<128x16xf32, #tpu.memory_space<vmem>>) attributes {dimension_semantics = [#tpu.dimension_semantics<arbitrary>], iteration_bounds = array<i64: 1>, scalar_prefetch = 0 : i64, scratch_operands = 0 : i64, tpu.core_type = #tpu.core_type<tc>, window_params = [{pipeline_mode = #tpu.pipeline_mode<synchronous>, transform_indices = @transform_0, window_bounds = array<i64: 128, 4>}, {pipeline_mode = #tpu.pipeline_mode<synchronous>, transform_indices = @transform_1, window_bounds = array<i64: 4, 16>}, {pipeline_mode = #tpu.pipeline_mode<synchronous>, transform_indices = @transform_2, window_bounds = array<i64: 128, 16>}]} {
    %c0 = arith.constant 0 : index
    %c0_0 = arith.constant 0 : index
    %0 = vector.load %arg1[%c0, %c0_0] : memref<128x4xf32, #tpu.memory_space<vmem>>, vector<128x4xf32>
    %1 = arith.truncf %0 : vector<128x4xf32> to vector<128x4xbf16>
    %c0_1 = arith.constant 0 : index
    %c0_2 = arith.constant 0 : index
    %2 = vector.load %arg2[%c0_1, %c0_2] : memref<4x16xbf16, #tpu.memory_space<vmem>>, vector<4x16xbf16>
    %cst = arith.constant dense<0.000000e+00> : vector<128x16xf32>
    %3 = tpu.matmul %1, %2, %cst {dimension_numbers = #tpu.dot_dimension_numbers<[1], [0], [0], [1], [0, 0, 1, 1], [], []>} : vector<128x4xbf16>, vector<4x16xbf16>, vector<128x16xf32> -> vector<128x16xf32>
    %c0_3 = arith.constant 0 : index
    %c0_4 = arith.constant 0 : index
    %4 = vector.load %arg3[%c0_3, %c0_4] : memref<128x16xf32, #tpu.memory_space<vmem>>, vector<128x16xf32>
    tpu.vector_store %arg3[%c0_3, %c0_4], %3 {strides = array<i32>} : memref<128x16xf32, #tpu.memory_space<vmem>>, vector<128x16xf32>,
    return
  }
  func.func @transform_0(%arg0: i32) -> (i32, i32) {
    %c0_i32 = arith.constant 0 : i32
    %c0_i32_0 = arith.constant 0 : i32
    %c0_i32_1 = arith.constant 0 : i32
    return %c0_i32, %c0_i32_0 : i32, i32
  }
  func.func @transform_1(%arg0: i32) -> (i32, i32) {
    %c0_i32 = arith.constant 0 : i32
    %c0_i32_0 = arith.constant 0 : i32
    %c0_i32_1 = arith.constant 0 : i32
    return %c0_i32, %c0_i32_0 : i32, i32
  }
  func.func @transform_2(%arg0: i32) -> (i32, i32) {
    %c0_i32 = arith.constant 0 : i32
    %c0_i32_0 = arith.constant 0 : i32
    %c0_i32_1 = arith.constant 0 : i32
    return %c0_i32, %c0_i32_0 : i32, i32
  }
}

</mosaic_0001>

<bundles_post_ra>
// kernel: tpu_custom_call.1
= control target key start
LH: loop header
LB: loop body
LE: loop exit
PB: predicated region body
PF: predicated region fallthrough
CT: control target
= control target key end

     0   :  { %vm62_vm0 = vcmask 1041408   ;;  %vm37_vm1 = vcmask 31744   ;;  %vm163_vm2 = vcmask 130048   ;;  %s361_s1 = inlined_call_operand.vmem [shape: bf16[4,16], index: 1, kind: input, shape index: {}]   ;;  %s362_s0 = inlined_call_operand.vmem [shape: f32[128,4], index: 0, kind: input, shape index: {}]   ;;  %s363_s2 = inlined_call_operand.vmem [shape: f32[128,16], index: 2, kind: output, shape index: {}]  }
   0x1   :  { %v36_v0 = vld [vmem:[%s361_s1] sm:$0x3]  ;;  %v13_v2 = vld [vmem:[%s362_s0 + $0x8] sm:$0xff]  ;;  %v14_v7 = vld [vmem:[%s362_s0 + $0x10] sm:$0xff] }
   0x2   :  { %v12_v1 = vld [vmem:[%s362_s0] sm:$0xff]  ;;  %221 = vmatprep.subr.msk.bf16.mxu0 %vm62_vm0, %v36_v0  ;;  %222 = vmatprep.subr.msk.bf16.mxu1 %vm62_vm0, %v36_v0  ;;  %v64_v3 = vsel %vm62_vm0, %v36_v0, 0  ;;  %v21_v6 = vld [vmem:[%s362_s0 + $0x48] sm:$0xff]  ;;  %v15_v9 = vld [vmem:[%s362_s0 + $0x18] sm:$0xff] }
   0x3   :  { %v28_v4 = vpack.c.bf16 %v13_v2, %v12_v1  ;;  %v20_v5 = vld [vmem:[%s362_s0 + $0x40] sm:$0xff]  ;;  %202 = vmatpush3.bf16.msra.mxu0 %v64_v3  ;;  %220 = vmatpush3.bf16.msra.mxu1 %v64_v3  ;;  %v22_v10 = vld [vmem:[%s362_s0 + $0x50] sm:$0xff]  ;;  %v23_v11 = vld [vmem:[%s362_s0 + $0x58] sm:$0xff]  ;;  %v29_v12 = vpack.c.bf16 %v15_v9, %v14_v7 }
   0x4   :  { %v32_v8 = vpack.c.bf16 %v21_v6, %v20_v5  ;;  %v33_v13 = vpack.c.bf16 %v23_v11, %v22_v10  ;;  %v16_v14 = vld [vmem:[%s362_s0 + $0x20] sm:$0xff]  ;;  %v17_v15 = vld [vmem:[%s362_s0 + $0x28] sm:$0xff]  ;;  %v18_v20 = vld [vmem:[%s362_s0 + $0x30] sm:$0xff] }
   0x5   :  { %203 = vmatprep.mubr.msk.bf16.mxu0 %vm37_vm1, %v28_v4  ;;  %v24_v16 = vld [vmem:[%s362_s0 + $0x60] sm:$0xff]  ;;  %v30_v17 = vpack.c.bf16 %v17_v15, %v16_v14  ;;  %v25_v18 = vld [vmem:[%s362_s0 + $0x68] sm:$0xff]  ;;  %v19_v21 = vld [vmem:[%s362_s0 + $0x38] sm:$0xff] }
   0x6   :  { %211 = vmatprep.mubr.msk.bf16.mxu1 %vm37_vm1, %v32_v8  ;;  %204 = vmatmul.mubr.msk.bf16.vlgmr.msra.gmra.mrb[0].mxu0 %vm37_vm1, %v29_v12  ;;  %v34_v19 = vpack.c.bf16 %v25_v18, %v24_v16  ;;  %v26_v22 = vld [vmem:[%s362_s0 + $0x70] sm:$0xff]  ;;  %v27_v23 = vld [vmem:[%s362_s0 + $0x78] sm:$0xff]  ;;  %v31_v24 = vpack.c.bf16 %v19_v21, %v18_v20 }
   0x7   :  { %212 = vmatmul.mubr.msk.bf16.vlgmr.msra.gmra.mrb[0].mxu1 %vm37_vm1, %v33_v13  ;;  %207 = vmatprep.mubr.msk.bf16.mxu0 %vm37_vm1, %v30_v17  ;;  %v35_v25 = vpack.c.bf16 %v27_v23, %v26_v22 }
   0x8   :  { %215 = vmatprep.mubr.msk.bf16.mxu1 %vm37_vm1, %v34_v19 }
   0xe   :  { %208 = vmatmul.mubr.msk.bf16.gmra.mrb[4].mxu0 %vm37_vm1, %v31_v24 }
   0xf   :  { %216 = vmatmul.mubr.msk.bf16.gmra.mrb[4].mxu1 %vm37_vm1, %v35_v25 }
  0xd9   :  { %v205_v26 = vpop.f32.mrb[0].mxu0 }
  0xda   :  { %v213_v27 = vpop.f32.mrb[0].mxu1  ;;  %166 = vst.msk [vmem:[%s363_s2 + $0x10] sm:$0xff] %vm163_vm2, %v205_v26  ;;  %v100_v28 = vpop.f32.mrb[1].mxu0 }
  0xdb   :  { %174 = vst.msk [vmem:[%s363_s2 + $0x50] sm:$0xff] %vm163_vm2, %v213_v27  ;;  %v132_v29 = vpop.f32.mrb[1].mxu1  ;;  %164 = vst.msk [vmem:[%s363_s2] sm:$0xff] %vm163_vm2, %v100_v28  ;;  %v206_v30 = vpop.f32.mrb[2].mxu0 }
  0xdc   :  { %172 = vst.msk [vmem:[%s363_s2 + $0x40] sm:$0xff] %vm163_vm2, %v132_v29  ;;  %v214_v31 = vpop.f32.mrb[2].mxu1  ;;  %167 = vst.msk [vmem:[%s363_s2 + $0x18] sm:$0xff] %vm163_vm2, %v206_v30  ;;  %v103_v32 = vpop.f32.mrb[3].mxu0 }
  0xdd   :  { %175 = vst.msk [vmem:[%s363_s2 + $0x58] sm:$0xff] %vm163_vm2, %v214_v31  ;;  %v135_v33 = vpop.f32.mrb[3].mxu1  ;;  %165 = vst.msk [vmem:[%s363_s2 + $0x8] sm:$0xff] %vm163_vm2, %v103_v32 }
  0xde   :  { %173 = vst.msk [vmem:[%s363_s2 + $0x48] sm:$0xff] %vm163_vm2, %v135_v33 }
  0xe1   :  { %v209_v34 = vpop.f32.mrb[4].mxu0 }
  0xe2   :  { %v217_v35 = vpop.f32.mrb[4].mxu1  ;;  %170 = vst.msk [vmem:[%s363_s2 + $0x30] sm:$0xff] %vm163_vm2, %v209_v34  ;;  %v116_v36 = vpop.f32.mrb[5].mxu0 }
  0xe3   :  { %178 = vst.msk [vmem:[%s363_s2 + $0x70] sm:$0xff] %vm163_vm2, %v217_v35  ;;  %v148_v37 = vpop.f32.mrb[5].mxu1  ;;  %168 = vst.msk [vmem:[%s363_s2 + $0x20] sm:$0xff] %vm163_vm2, %v116_v36  ;;  %v210_v38 = vpop.f32.mrb[6].mxu0 }
  0xe4   :  { %176 = vst.msk [vmem:[%s363_s2 + $0x60] sm:$0xff] %vm163_vm2, %v148_v37  ;;  %v218_v39 = vpop.f32.mrb[6].mxu1  ;;  %171 = vst.msk [vmem:[%s363_s2 + $0x38] sm:$0xff] %vm163_vm2, %v210_v38  ;;  %v119_v40 = vpop.f32.mrb[7].mxu0 }
  0xe5   :  { %179 = vst.msk [vmem:[%s363_s2 + $0x78] sm:$0xff] %vm163_vm2, %v218_v39  ;;  %v151_v41 = vpop.f32.mrb[7].mxu1  ;;  %169 = vst.msk [vmem:[%s363_s2 + $0x28] sm:$0xff] %vm163_vm2, %v119_v40 }
  0xe6   :  { %177 = vst.msk [vmem:[%s363_s2 + $0x68] sm:$0xff] %vm163_vm2, %v151_v41 }

</bundles_post_ra>
